<compile_context>
chip_gen: v6e
topology: v6e:2x2x1
jax: 0.10.0
libtpu: 0.0.40
codegen_flags: <defaults>
</compile_context>

<pallas_src>
import functools

import jax
import jax.numpy as jnp
from jax.experimental import pallas as pl
from jax.experimental.pallas import tpu as pltpu

_LANE = 128


def _round_up(x, m):
    return ((x + m - 1) // m) * m


def _actor_kernel(state_ref, action_ref,
                  w1s_ref, w1a_ref, b1_ref,
                  w2_ref, b2_ref,
                  w3_ref, b3_ref,
                  o_ref, *, phi, max_action, action_dim):
    """One batch-tile of the full MLP + output transform.

    state_ref  : [tb, state_dim]   f32
    action_ref : [tb, action_dim]  f32
    w1s/w1a    : [state_dim, H0] / [action_dim, H0]  bf16 (split layer-0 weight)
    w2         : [H0, H1]                            bf16
    w3         : [H1, A_pad]                         bf16 (cols >= action_dim are 0)
    b1, b2     : [1, H0], [1, H1]                    f32
    b3         : [1, A_pad]                          f32  (cols >= action_dim are 0)
    o_ref      : [tb, A_pad]                         f32
    """
    s = state_ref[...]
    a = action_ref[...]

    # layer 0: Linear(cat[state, action]) + ReLU, expressed as two bf16 matmuls
    # into one f32 accumulator (identical math to the concatenated form).
    h1 = (jnp.dot(s.astype(jnp.bfloat16), w1s_ref[...],
                  preferred_element_type=jnp.float32)
          + jnp.dot(a.astype(jnp.bfloat16), w1a_ref[...],
                    preferred_element_type=jnp.float32)
          + b1_ref[...])
    h1 = jnp.maximum(h1, 0.0)

    # layer 1: Linear + ReLU
    h2 = jnp.dot(h1.astype(jnp.bfloat16), w2_ref[...],
                 preferred_element_type=jnp.float32) + b2_ref[...]
    h2 = jnp.maximum(h2, 0.0)

    # layer 2: Linear + Tanh (lane-padded output columns give tanh(0) = 0).
    y = jnp.tanh(jnp.dot(h2.astype(jnp.bfloat16), w3_ref[...],
                         preferred_element_type=jnp.float32) + b3_ref[...])

    # outputs = clamp(phi * max_action * nn(inputs) + action, -max_action, max_action)
    # Zero-pad action up to the lane-dense output width so the padded output
    # columns stay exactly 0 (tanh(0) = 0, + 0, clip -> 0).
    out_w = o_ref.shape[-1]
    if out_w != action_dim:
        a_full = jnp.concatenate(
            [a, jnp.zeros((a.shape[0], out_w - action_dim), a.dtype)], axis=1)
    else:
        a_full = a

    out = jnp.clip(phi * max_action * y + a_full, -max_action, max_action)
    o_ref[...] = out.astype(o_ref.dtype)


def prepare_actor_params(params, state_dim):
    """One-time weight preprocessing (hoisted out of the per-call forward path).

    Splits the layer-0 weight at the state/action boundary (so no host-side
    concat is ever needed), casts weights to bf16 / biases to f32, and
    zero-pads the output layer to a lane-dense width (multiple of 128).
    """
    w1, b1, w2, b2, w3, b3 = params
    S = state_dim
    A = w3.shape[1]
    A_pad = _round_up(max(A, _LANE), _LANE)

    w1s = w1[:S].astype(jnp.bfloat16)
    w1a = w1[S:].astype(jnp.bfloat16)
    w2b = w2.astype(jnp.bfloat16)

    w3p = jnp.zeros((w3.shape[0], A_pad), jnp.bfloat16)
    w3p = w3p.at[:, :A].set(w3.astype(jnp.bfloat16))
    b3p = jnp.zeros((1, A_pad), jnp.float32)
    b3p = b3p.at[:, :A].set(jnp.reshape(b3.astype(jnp.float32), (1, A)))

    b1f = jnp.reshape(b1.astype(jnp.float32), (1, -1))
    b2f = jnp.reshape(b2.astype(jnp.float32), (1, -1))

    return (w1s, w1a, b1f, w2b, b2f, w3p, b3p)


def actor_forward(state, action, prepared, *, phi, max_action, tile_b=None):
    """Pallas wrapper reproducing Actor.forward semantics."""
    state = state.astype(jnp.float32)
    action = action.astype(jnp.float32)

    w1s, w1a, b1, w2, b2, w3, b3 = prepared
    B, S = state.shape
    A = action.shape[1]
    A_pad = w3.shape[1]

    if tile_b is None:
        # Big tiles amortize the ~0.35us per-grid-step fixed cost; cap so large
        # batches still produce >=2 grid steps and both v7x TensorCores get
        # work (single-TC v5e/v6e just see a near-maximal tile).
        tile_b = min(1024, _round_up(pl.cdiv(max(B, 1), 2), 8))

    grid = (pl.cdiv(B, tile_b),)  # ragged last block: reads clipped, writes masked

    batch_spec = lambda width: pl.BlockSpec((tile_b, width), lambda i: (i, 0))
    resident = lambda arr: pl.BlockSpec(arr.shape, lambda i: (0, 0))  # weights stay in VMEM

    kernel = functools.partial(_actor_kernel,
                               phi=float(phi), max_action=float(max_action),
                               action_dim=A)

    out = pl.pallas_call(
        kernel,
        out_shape=jax.ShapeDtypeStruct((B, A_pad), jnp.float32),
        grid=grid,
        in_specs=[
            batch_spec(S),          # state
            batch_spec(A),          # action
            resident(w1s), resident(w1a), resident(b1),
            resident(w2), resident(b2),
            resident(w3), resident(b3),
        ],
        out_specs=batch_spec(A_pad),
        compiler_params=pltpu.CompilerParams(
            dimension_semantics=("parallel",)),
    )(state, action, w1s, w1a, b1, w2, b2, w3, b3)

    # Lane-dense slab -> true action width (or feed the padded slab downstream).
    return out[:, :A] if A_pad != A else out


def init_actor_params(key, state_dim, action_dim, hidden_dims=(256, 256)):
    """Deterministic synthetic init mirroring the layer shapes of Actor.__init__."""
    sizes = (state_dim + action_dim,) + tuple(hidden_dims) + (action_dim,)
    params = []
    keys = jax.random.split(key, len(sizes) - 1)
    for k, (d_in, d_out) in zip(keys, zip(sizes[:-1], sizes[1:])):
        kw, kb = jax.random.split(k)
        bound = 1.0 / jnp.sqrt(d_in)  # torch.nn.Linear default-style uniform init
        w = jax.random.uniform(kw, (d_in, d_out), jnp.float32, -bound, bound)
        b = jax.random.uniform(kb, (1, d_out), jnp.float32, -bound, bound)
        params.extend([w, b])
    return tuple(params)


if __name__ == "__main__":
    key = jax.random.PRNGKey(0)

    batch = 2
    state_dim = 12
    action_dim = 4
    hidden_dims = (256, 256)
    phi = 0.05
    max_action = 1.0

    k_params, k_state, k_action = jax.random.split(key, 3)
    params = init_actor_params(k_params, state_dim, action_dim, hidden_dims)
    prepared = prepare_actor_params(params, state_dim)  # one-time, hoisted

    state = jax.random.normal(k_state, (batch, state_dim), jnp.float32)
    action = jax.random.uniform(k_action, (batch, action_dim), jnp.float32,
                                -max_action, max_action)

    fwd = jax.jit(functools.partial(actor_forward, phi=phi, max_action=max_action))
    out = fwd(state, action, prepared)
    jax.block_until_ready(out)
    assert out.shape == (batch, action_dim)

    w1, b1, w2, b2, w3, b3 = params

    # bf16-matched reference (same precision recipe as the kernel).
    w1s = w1[:state_dim].astype(jnp.bfloat16)
    w1a = w1[state_dim:].astype(jnp.bfloat16)
    h1 = jnp.maximum(
        jnp.dot(state.astype(jnp.bfloat16), w1s, preferred_element_type=jnp.float32)
        + jnp.dot(action.astype(jnp.bfloat16), w1a, preferred_element_type=jnp.float32)
        + b1, 0.0)
    h2 = jnp.maximum(
        jnp.dot(h1.astype(jnp.bfloat16), w2.astype(jnp.bfloat16),
                preferred_element_type=jnp.float32) + b2, 0.0)
    y = jnp.tanh(jnp.dot(h2.astype(jnp.bfloat16), w3.astype(jnp.bfloat16),
                         preferred_element_type=jnp.float32) + b3)
    ref_bf16 = jnp.clip(phi * max_action * y + action, -max_action, max_action)
    assert jnp.allclose(out, ref_bf16, atol=1e-4, rtol=1e-4)

    # full-f32 torch-semantics reference (loose tolerance: bf16 weights, phi-scaled).
    x = jnp.concatenate([state, action], axis=1)
    h1f = jnp.maximum(x @ w1 + b1, 0.0)
    h2f = jnp.maximum(h1f @ w2 + b2, 0.0)
    yf = jnp.tanh(h2f @ w3 + b3)
    ref_f32 = jnp.clip(phi * max_action * yf + action, -max_action, max_action)
    assert jnp.allclose(out, ref_f32, atol=1e-2, rtol=1e-2)

    # Exercise a batch that is not a multiple of the tile (ragged last block path).
    big_state = jax.random.normal(key, (300, state_dim), jnp.float32)
    big_action = jax.random.uniform(key, (300, action_dim), jnp.float32,
                                    -max_action, max_action)
    big_out = fwd(big_state, big_action, prepared)
    jax.block_until_ready(big_out)
    assert big_out.shape == (300, action_dim)

    print("KERNEL_OK")
</pallas_src>

<mosaic_0001>
module attributes {stable_mosaic.version = 11 : i64} {
  func.func @_actor_kernel(%arg0: i32, %arg1: memref<8x12xf32, #tpu.memory_space<vmem>>, %arg2: memref<8x4xf32, #tpu.memory_space<vmem>>, %arg3: memref<12x256xbf16, #tpu.memory_space<vmem>>, %arg4: memref<4x256xbf16, #tpu.memory_space<vmem>>, %arg5: memref<1x256xf32, #tpu.memory_space<vmem>>, %arg6: memref<256x256xbf16, #tpu.memory_space<vmem>>, %arg7: memref<1x256xf32, #tpu.memory_space<vmem>>, %arg8: memref<256x128xbf16, #tpu.memory_space<vmem>>, %arg9: memref<1x128xf32, #tpu.memory_space<vmem>>, %arg10: memref<8x128xf32, #tpu.memory_space<vmem>>) attributes {dimension_semantics = [#tpu.dimension_semantics<parallel>], iteration_bounds = array<i64: 1>, scalar_prefetch = 0 : i64, scratch_operands = 0 : i64, tpu.core_type = #tpu.core_type<tc>, window_params = [{transform_indices = @transform_0, window_bounds = array<i64: 8, 12>}, {transform_indices = @transform_1, window_bounds = array<i64: 8, 4>}, {pipeline_mode = #tpu.pipeline_mode<synchronous>, transform_indices = @transform_2, window_bounds = array<i64: 12, 256>}, {pipeline_mode = #tpu.pipeline_mode<synchronous>, transform_indices = @transform_3, window_bounds = array<i64: 4, 256>}, {pipeline_mode = #tpu.pipeline_mode<synchronous>, transform_indices = @transform_4, window_bounds = array<i64: 1, 256>}, {pipeline_mode = #tpu.pipeline_mode<synchronous>, transform_indices = @transform_5, window_bounds = array<i64: 256, 256>}, {pipeline_mode = #tpu.pipeline_mode<synchronous>, transform_indices = @transform_6, window_bounds = array<i64: 1, 256>}, {pipeline_mode = #tpu.pipeline_mode<synchronous>, transform_indices = @transform_7, window_bounds = array<i64: 256, 128>}, {pipeline_mode = #tpu.pipeline_mode<synchronous>, transform_indices = @transform_8, window_bounds = array<i64: 1, 128>}, {transform_indices = @transform_9, window_bounds = array<i64: 8, 128>}]} {
    %c0 = arith.constant 0 : index
    %c0_0 = arith.constant 0 : index
    %0 = vector.load %arg1[%c0, %c0_0] : memref<8x12xf32, #tpu.memory_space<vmem>>, vector<8x12xf32>
    %c0_1 = arith.constant 0 : index
    %c0_2 = arith.constant 0 : index
    %1 = vector.load %arg2[%c0_1, %c0_2] : memref<8x4xf32, #tpu.memory_space<vmem>>, vector<8x4xf32>
    %2 = arith.truncf %0 : vector<8x12xf32> to vector<8x12xbf16>
    %c0_3 = arith.constant 0 : index
    %c0_4 = arith.constant 0 : index
    %3 = vector.load %arg3[%c0_3, %c0_4] : memref<12x256xbf16, #tpu.memory_space<vmem>>, vector<12x256xbf16>
    %cst = arith.constant dense<0.000000e+00> : vector<8x256xf32>
    %4 = tpu.matmul %2, %3, %cst {dimension_numbers = #tpu.dot_dimension_numbers<[1], [0], [0], [1], [0, 0, 1, 1], [], []>} : vector<8x12xbf16>, vector<12x256xbf16>, vector<8x256xf32> -> vector<8x256xf32>
    %5 = arith.truncf %1 : vector<8x4xf32> to vector<8x4xbf16>
    %c0_5 = arith.constant 0 : index
    %c0_6 = arith.constant 0 : index
    %6 = vector.load %arg4[%c0_5, %c0_6] : memref<4x256xbf16, #tpu.memory_space<vmem>>, vector<4x256xbf16>
    %cst_7 = arith.constant dense<0.000000e+00> : vector<8x256xf32>
    %7 = tpu.matmul %5, %6, %cst_7 {dimension_numbers = #tpu.dot_dimension_numbers<[1], [0], [0], [1], [0, 0, 1, 1], [], []>} : vector<8x4xbf16>, vector<4x256xbf16>, vector<8x256xf32> -> vector<8x256xf32>
    %8 = arith.addf %4, %7 : vector<8x256xf32>
    %c0_8 = arith.constant 0 : index
    %c0_9 = arith.constant 0 : index
    %9 = vector.load %arg5[%c0_8, %c0_9] : memref<1x256xf32, #tpu.memory_space<vmem>>, vector<1x256xf32>
    %10 = vector.broadcast %9 : vector<1x256xf32> to vector<8x256xf32>
    %11 = arith.addf %8, %10 : vector<8x256xf32>
    %cst_10 = arith.constant 0.000000e+00 : f32
    %12 = vector.broadcast %cst_10 : f32 to vector<8x256xf32>
    %13 = arith.maximumf %11, %12 : vector<8x256xf32>
    %14 = arith.truncf %13 : vector<8x256xf32> to vector<8x256xbf16>
    %c0_11 = arith.constant 0 : index
    %c0_12 = arith.constant 0 : index
    %15 = vector.load %arg6[%c0_11, %c0_12] : memref<256x256xbf16, #tpu.memory_space<vmem>>, vector<256x256xbf16>
    %cst_13 = arith.constant dense<0.000000e+00> : vector<8x256xf32>
    %16 = tpu.matmul %14, %15, %cst_13 {dimension_numbers = #tpu.dot_dimension_numbers<[1], [0], [0], [1], [0, 0, 1, 1], [], []>} : vector<8x256xbf16>, vector<256x256xbf16>, vector<8x256xf32> -> vector<8x256xf32>
    %c0_14 = arith.constant 0 : index
    %c0_15 = arith.constant 0 : index
    %17 = vector.load %arg7[%c0_14, %c0_15] : memref<1x256xf32, #tpu.memory_space<vmem>>, vector<1x256xf32>
    %18 = vector.broadcast %17 : vector<1x256xf32> to vector<8x256xf32>
    %19 = arith.addf %16, %18 : vector<8x256xf32>
    %cst_16 = arith.constant 0.000000e+00 : f32
    %20 = vector.broadcast %cst_16 : f32 to vector<8x256xf32>
    %21 = arith.maximumf %19, %20 : vector<8x256xf32>
    %22 = arith.truncf %21 : vector<8x256xf32> to vector<8x256xbf16>
    %c0_17 = arith.constant 0 : index
    %c0_18 = arith.constant 0 : index
    %23 = vector.load %arg8[%c0_17, %c0_18] : memref<256x128xbf16, #tpu.memory_space<vmem>>, vector<256x128xbf16>
    %cst_19 = arith.constant dense<0.000000e+00> : vector<8x128xf32>
    %24 = tpu.matmul %22, %23, %cst_19 {dimension_numbers = #tpu.dot_dimension_numbers<[1], [0], [0], [1], [0, 0, 1, 1], [], []>} : vector<8x256xbf16>, vector<256x128xbf16>, vector<8x128xf32> -> vector<8x128xf32>
    %c0_20 = arith.constant 0 : index
    %c0_21 = arith.constant 0 : index
    %25 = vector.load %arg9[%c0_20, %c0_21] : memref<1x128xf32, #tpu.memory_space<vmem>>, vector<1x128xf32>
    %26 = vector.broadcast %25 : vector<1x128xf32> to vector<8x128xf32>
    %27 = arith.addf %24, %26 : vector<8x128xf32>
    %28 = math.tanh %27 : vector<8x128xf32>
    %cst_22 = arith.constant 0.000000e+00 : f32
    %29 = vector.broadcast %cst_22 : f32 to vector<8x124xf32>
    %30 = tpu.concatenate %1, %29 in 1 : vector<8x4xf32>, vector<8x124xf32> -> vector<8x128xf32>
    %cst_23 = arith.constant 5.000000e-02 : f32
    %31 = vector.broadcast %cst_23 : f32 to vector<8x128xf32>
    %32 = arith.mulf %31, %28 : vector<8x128xf32>
    %33 = arith.addf %32, %30 : vector<8x128xf32>
    %cst_24 = arith.constant -1.000000e+00 : f32
    %cst_25 = arith.constant 1.000000e+00 : f32
    %34 = vector.broadcast %cst_24 : f32 to vector<8x128xf32>
    %35 = arith.maximumf %34, %33 : vector<8x128xf32>
    %36 = vector.broadcast %cst_25 : f32 to vector<8x128xf32>
    %37 = arith.minimumf %36, %35 : vector<8x128xf32>
    %c0_26 = arith.constant 0 : index
    %c0_27 = arith.constant 0 : index
    %38 = vector.load %arg10[%c0_26, %c0_27] : memref<8x128xf32, #tpu.memory_space<vmem>>, vector<8x128xf32>
    tpu.vector_store %arg10[%c0_26, %c0_27], %37 {strides = array<i32>} : memref<8x128xf32, #tpu.memory_space<vmem>>, vector<8x128xf32>,
    return
  }
  func.func @transform_0(%arg0: i32) -> (i32, i32) {
    %c0_i32 = arith.constant 0 : i32
    %c0_i32_0 = arith.constant 0 : i32
    return %arg0, %c0_i32 : i32, i32
  }
  func.func @transform_1(%arg0: i32) -> (i32, i32) {
    %c0_i32 = arith.constant 0 : i32
    %c0_i32_0 = arith.constant 0 : i32
    return %arg0, %c0_i32 : i32, i32
  }
  func.func @transform_2(%arg0: i32) -> (i32, i32) {
    %c0_i32 = arith.constant 0 : i32
    %c0_i32_0 = arith.constant 0 : i32
    %c0_i32_1 = arith.constant 0 : i32
    return %c0_i32, %c0_i32_0 : i32, i32
  }
  func.func @transform_3(%arg0: i32) -> (i32, i32) {
    %c0_i32 = arith.constant 0 : i32
    %c0_i32_0 = arith.constant 0 : i32
    %c0_i32_1 = arith.constant 0 : i32
    return %c0_i32, %c0_i32_0 : i32, i32
  }
  func.func @transform_4(%arg0: i32) -> (i32, i32) {
    %c0_i32 = arith.constant 0 : i32
    %c0_i32_0 = arith.constant 0 : i32
    %c0_i32_1 = arith.constant 0 : i32
    return %c0_i32, %c0_i32_0 : i32, i32
  }
  func.func @transform_5(%arg0: i32) -> (i32, i32) {
    %c0_i32 = arith.constant 0 : i32
    %c0_i32_0 = arith.constant 0 : i32
    %c0_i32_1 = arith.constant 0 : i32
    return %c0_i32, %c0_i32_0 : i32, i32
  }
  func.func @transform_6(%arg0: i32) -> (i32, i32) {
    %c0_i32 = arith.constant 0 : i32
    %c0_i32_0 = arith.constant 0 : i32
    %c0_i32_1 = arith.constant 0 : i32
    return %c0_i32, %c0_i32_0 : i32, i32
  }
  func.func @transform_7(%arg0: i32) -> (i32, i32) {
    %c0_i32 = arith.constant 0 : i32
    %c0_i32_0 = arith.constant 0 : i32
    %c0_i32_1 = arith.constant 0 : i32
    return %c0_i32, %c0_i32_0 : i32, i32
  }
  func.func @transform_8(%arg0: i32) -> (i32, i32) {
    %c0_i32 = arith.constant 0 : i32
    %c0_i32_0 = arith.constant 0 : i32
    %c0_i32_1 = arith.constant 0 : i32
    return %c0_i32, %c0_i32_0 : i32, i32
  }
  func.func @transform_9(%arg0: i32) -> (i32, i32) {
    %c0_i32 = arith.constant 0 : i32
    %c0_i32_0 = arith.constant 0 : i32
    return %arg0, %c0_i32 : i32, i32
  }
}

</mosaic_0001>

<bundles_post_ra>
// kernel: actor_forward.1
= control target key start
LH: loop header
LB: loop body
LE: loop exit
PB: predicated region body
PF: predicated region fallthrough
CT: control target
= control target key end

     0   :  { %14 = vsyncpa [#allocation3], 0  ;;  %s1094_s0 = inlined_call_operand.hbm [shape: f32[2,12], index: 0, kind: input, shape index: {}]   ;;  %s1095_s1 = inlined_call_operand.hbm [shape: f32[2,4], index: 1, kind: input, shape index: {}]   ;;  %s1096_s2 = inlined_call_operand.hbm [shape: bf16[12,256], index: 2, kind: input, shape index: {}]   ;;  %s1097_s3 = inlined_call_operand.vmem [shape: bf16[4,256], index: 3, kind: input, shape index: {}]   ;;  %s1098_s4 = inlined_call_operand.vmem [shape: f32[1,256], index: 4, kind: input, shape index: {}]   ;;  %s1099_s5 = inlined_call_operand.hbm [shape: bf16[256,256], index: 5, kind: input, shape index: {}]   ;;  %s1100_s6 = inlined_call_operand.vmem [shape: f32[1,256], index: 6, kind: input, shape index: {}]   ;;  %s1101_s7 = inlined_call_operand.hbm [shape: bf16[256,128], index: 7, kind: input, shape index: {}]   ;;  %s1102_s8 = inlined_call_operand.vmem [shape: f32[1,128], index: 8, kind: input, shape index: {}]   ;;  %s1103_s9 = inlined_call_operand.hbm [shape: f32[2,128], index: 9, kind: output, shape index: {}]  }
   0x1   :  { %15 = vsyncpa [#allocation6], 0 }
   0x2   :  { %16 = vsyncpa [#allocation9], 0 }
   0x3   :  { %17 = vsyncpa [#allocation4], 0 }
   0x4   :  { %22 = vsyncadd [#allocation3], 96  ;;  %s987_s30 = smov [#allocation2]  }
   0x5   :  { %s23_s10 = sshll.u32 %s987_s30, 4  ;;  %s24_s10 = int_to_ptr.vmem [resolvable:$true] %s23_s10 }
   0x6   :  { %s867_s11 = scalar_lea.vmem %s24_s10, 32  ;;  %s871_s12 = scalar_lea.vmem %s24_s10, 128 }
   0x7   :  { %p868_p0 = scmp.ne.s32.totalorder %s24_s10, %s867_s11  ;;  %p872_p1 = scmp.lt.s32.totalorder %s24_s10, %s24_s10 }
   0x8   :  { %p873_p2 = scmp.lt.s32.totalorder %s871_s12, %s867_s11 }
   0xa   :  { %p874_p3 = por %p873_p2, %p872_p1 }
   0xc   :  { %p875_p4 = pnand %p874_p3, %p868_p0 }
   0xe   :  { %878 = shalt.err (!%p875_p4)
}
   0xf   :  { %s988_s13 = smov 32   ;;  %s989_s14 = smov 2  }
  0x10   :  { %29 = dma.hbm_to_vmem [thread:$0]  %s1094_s0, 32, %s24_s10, [#allocation3], %s988_s13, %s988_s13, %s989_s14  }
  0x11   :  { %34 = vsyncadd [#allocation6], 96  ;;  %s990_s17 = smov [#allocation5]  }
  0x12   :  { %s35_s18 = sshll.u32 %s990_s17, 4  ;;  %s36_s18 = int_to_ptr.vmem [resolvable:$true] %s35_s18 }
  0x13   :  { %s887_s19 = scalar_lea.vmem %s36_s18, 32  ;;  %s891_s20 = scalar_lea.vmem %s36_s18, 128 }
  0x14   :  { %p888_p5 = scmp.ne.s32.totalorder %s36_s18, %s887_s19  ;;  %p892_p6 = scmp.lt.s32.totalorder %s36_s18, %s36_s18 }
  0x15   :  { %p893_p7 = scmp.lt.s32.totalorder %s891_s20, %s887_s19 }
  0x17   :  { %p894_p8 = por %p893_p7, %p892_p6 }
  0x19   :  { %p895_p9 = pnand %p894_p8, %p888_p5 }
  0x1b   :  { %898 = shalt.err (!%p895_p9)
}
  0x1c   :  { %41 = dma.hbm_to_vmem [thread:$0]  %s1095_s1, 32, %s36_s18, [#allocation6], %s988_s13, %s988_s13, %s989_s14  }
  0x1d   :  { %s991_s0 = smov [#allocation8]   ;;  %s992_s24 = smov [#allocation7]  }
  0x1e   :  { %s63_s23 = sshll.u32 %s991_s0, 4  ;;  %s47_s25 = sshll.u32 %s992_s24, 4  ;;  %s64_s23 = int_to_ptr.vmem [resolvable:$true] %s63_s23  ;;  %s48_s25 = int_to_ptr.vmem [resolvable:$true] %s47_s25 }
  0x1f   :  { %s907_s26 = scalar_lea.vmem %s64_s23, 4096  ;;  %p912_p11 = scmp.lt.s32.totalorder %s64_s23, %s64_s23 }
  0x20   :  { %p908_p10 = scmp.ne.s32.totalorder %s64_s23, %s907_s26  ;;  %p913_p12 = scmp.lt.s32.totalorder %s907_s26, %s907_s26 }
  0x22   :  { %p914_p13 = por %p913_p12, %p912_p11 }
  0x24   :  { %p915_p0 = pnand %p914_p13, %p908_p10 }
  0x26   :  { %918 = shalt.err (!%p915_p0)
}
  0x27   :  { %s993_s27 = smov 128   ;;  %s994_s28 = smov 8  }
  0x28   :  { %69 = dma.hbm_to_vmem [thread:$0]  %s1099_s5, 4096, %s64_s23, [#allocation9], %s993_s27, %s993_s27, %s994_s28  }
  0x29   :  { %s927_s1 = scalar_lea.vmem %s48_s25, 256  ;;  %p932_p2 = scmp.lt.s32.totalorder %s48_s25, %s48_s25 }
  0x2a   :  { %p928_p1 = scmp.ne.s32.totalorder %s48_s25, %s927_s1  ;;  %p933_p3 = scmp.lt.s32.totalorder %s927_s1, %s927_s1 }
  0x2c   :  { %p934_p4 = por %p933_p3, %p932_p2 }
  0x2e   :  { %p935_p5 = pnand %p934_p4, %p928_p1 }
  0x30   :  { %938 = shalt.err (!%p935_p5)
}
  0x31   :  { %53 = dma.hbm_to_vmem [thread:$0]  %s1096_s2, 256, %s48_s25, [#allocation6], %s993_s27, %s993_s27, %s994_s28  }
  0x32   :  { %s995_s12 = smov [#allocation10]  }
  0x33   :  { %s77_s15 = sshll.u32 %s995_s12, 4  ;;  %s78_s15 = int_to_ptr.vmem [resolvable:$true] %s77_s15 }
  0x34   :  { %s947_s16 = scalar_lea.vmem %s78_s15, 2048  ;;  %p952_p7 = scmp.lt.s32.totalorder %s78_s15, %s78_s15 }
  0x35   :  { %p948_p6 = scmp.ne.s32.totalorder %s78_s15, %s947_s16  ;;  %p953_p8 = scmp.lt.s32.totalorder %s947_s16, %s947_s16 }
  0x37   :  { %p954_p9 = por %p953_p8, %p952_p7 }
  0x39   :  { %p955_p10 = pnand %p954_p9, %p948_p6 }
  0x3b   :  { %958 = shalt.err (!%p955_p10)
}
  0x3c   :  { %s996_s5 = smov 64   ;;  %s997_s17 = smov 4  }
  0x3d   :  { %83 = dma.hbm_to_vmem [thread:$0]  %s1101_s7, 2048, %s78_s15, [#allocation9], %s996_s5, %s996_s5, %s997_s17  }
  0x3e   :  { %979 = dma.done.wait [#allocation3], 128  }
  0x3f   :  { %980 = vsyncadd [#allocation3], 4294967168 }
  0x40   :  { %981 = dma.done.wait [#allocation6], 384  }
  0x41   :  { %982 = vsyncadd [#allocation6], 4294966912 }
  0x42   :  { %983 = dma.done.wait [#allocation9], 6144  }
  0x43   :  { %984 = vsyncadd [#allocation9], 4294961152  ;;  %v998_v0 = vmov 0   ;;  %vm122_vm0 = vcmask 1041408   ;;  %vm118_vm1 = vcmask 31744   ;;  %v103_v2 = vld [vmem:[#allocation5] sm:$0xff]  ;;  %v232_v56 = vlaneseq }
  0x44   :  { %161 = vmatprep.mubr.bf16.mxu1 %v998_v0  ;;  %v698_v1 = vld.sshfl [vmem:[%s1097_s3] sm:$0x33 pattern:$0x76325410]  ;;  %v1075_v5 = vsel %vm118_vm1, %v103_v2, 0.0  ;;  %vm182_vm2 = vcmask 1045504   ;;  %v107_v8 = vpack.c.bf16 %v103_v2, %v103_v2 }
  0x45   :  { %v117_v3 = vcombine.high %v698_v1, %v698_v1  ;;  %v124_v4 = vsel %vm122_vm0, %v698_v1, 0  ;;  %v790_v6 = vld [vmem:[#allocation7 + $0x4] ss:$8 sps:$4 sm:$0x3f]   ;;  %v795_v10 = vld [vmem:[#allocation8 + $0x70] ss:$8 sps:$4 sm:$0xff]  }
  0x46   :  { %v792_v7 = vld [vmem:[#allocation7] ss:$8 sps:$4 sm:$0x3f]   ;;  %v793_v9 = vld [vmem:[#allocation8 + $0x74] ss:$8 sps:$4 sm:$0xff]   ;;  %v102_v15 = vld [vmem:[#allocation2] sm:$0xff] }
  0x47   :  { %699 = vmatprep.subr.msk.bf16.mxu1 %vm122_vm0, %v117_v3  ;;  %v796_v11 = vld [vmem:[#allocation8 + $0x64] ss:$8 sps:$4 sm:$0xff]   ;;  %v184_v12 = vsel %vm182_vm2, %v792_v7, 0  ;;  %452 = vmatprep.subr.bf16.mxu0 %v793_v9  ;;  %v798_v13 = vld [vmem:[#allocation8 + $0x60] ss:$8 sps:$4 sm:$0xff]   ;;  %v104_v17 = vpack.c.bf16 %v102_v15, %v102_v15  ;;  %vm178_vm3 = vcmask 97280  }
  0x48   :  { %144 = vmatpush1.bf16.msra.mxu1 %v124_v4  ;;  %453 = vmatpush1.bf16.msra.mxu0 %v795_v10  ;;  %v799_v14 = vld [vmem:[#allocation8 + $0x54] ss:$8 sps:$4 sm:$0xff]   ;;  %v801_v16 = vld [vmem:[#allocation8 + $0x50] ss:$8 sps:$4 sm:$0xff]   ;;  %v802_v18 = vld [vmem:[#allocation8 + $0x44] ss:$8 sps:$4 sm:$0xff]  }
  0x49   :  { %703 = vmatprep.subr.msk.bf16.mxu1 %vm182_vm2, %v790_v6  ;;  %454 = vmatprep.subr.bf16.mxu0 %v796_v11  ;;  %v804_v19 = vld [vmem:[#allocation8 + $0x40] ss:$8 sps:$4 sm:$0xff]   ;;  %v805_v20 = vld [vmem:[#allocation8 + $0x34] ss:$8 sps:$4 sm:$0xff]   ;;  %v807_v21 = vld [vmem:[#allocation8 + $0x30] ss:$8 sps:$4 sm:$0xff]  }
  0x4a   :  { %v808_v22 = vld [vmem:[#allocation8 + $0x24] ss:$8 sps:$4 sm:$0xff]   ;;  %v810_v23 = vld [vmem:[#allocation8 + $0x20] ss:$8 sps:$4 sm:$0xff]   ;;  %v811_v24 = vld [vmem:[#allocation8 + $0x14] ss:$8 sps:$4 sm:$0xff]  }
  0x4b   :  { %700 = vmatmul.mubr.msk.bf16.vlgmr.msra.gmra.mxu1 %vm118_vm1, %v107_v8  ;;  %v813_v25 = vld [vmem:[#allocation8 + $0x10] ss:$8 sps:$4 sm:$0xff]   ;;  %v814_v26 = vld [vmem:[#allocation8 + $0x4] ss:$8 sps:$4 sm:$0xff]   ;;  %v816_v27 = vld [vmem:[#allocation8] ss:$8 sps:$4 sm:$0xff]  }
  0x4c   :  { %204 = vmatpush1.bf16.msra.mxu1 %v184_v12  ;;  %221 = vmatprep.mubr.bf16.mxu1 %v998_v0  ;;  %v817_v28 = vld [vmem:[#allocation8 + $0xf4] ss:$8 sps:$4 sm:$0xff]   ;;  %v819_v29 = vld [vmem:[#allocation8 + $0xf0] ss:$8 sps:$4 sm:$0xff]   ;;  %v820_v30 = vld [vmem:[#allocation8 + $0xe4] ss:$8 sps:$4 sm:$0xff]  }
  0x4d   :  { %455 = vmatpush1.bf16.msra.mxu0 %v798_v13  ;;  %v822_v31 = vld [vmem:[#allocation8 + $0xe0] ss:$8 sps:$4 sm:$0xff]   ;;  %v823_v32 = vld [vmem:[#allocation8 + $0xd4] ss:$8 sps:$4 sm:$0xff]   ;;  %v825_v33 = vld [vmem:[#allocation8 + $0xd0] ss:$8 sps:$4 sm:$0xff]  }
  0x4e   :  { %456 = vmatprep.subr.bf16.mxu0 %v799_v14  ;;  %v826_v34 = vld [vmem:[#allocation8 + $0xc4] ss:$8 sps:$4 sm:$0xff]   ;;  %v828_v35 = vld [vmem:[#allocation8 + $0xc0] ss:$8 sps:$4 sm:$0xff]   ;;  %v829_v36 = vld [vmem:[#allocation8 + $0xb4] ss:$8 sps:$4 sm:$0xff]  }
  0x4f   :  { %v831_v37 = vld [vmem:[#allocation8 + $0xb0] ss:$8 sps:$4 sm:$0xff]   ;;  %v832_v38 = vld [vmem:[#allocation8 + $0xa4] ss:$8 sps:$4 sm:$0xff]   ;;  %v834_v39 = vld [vmem:[#allocation8 + $0xa0] ss:$8 sps:$4 sm:$0xff]  }
  0x50   :  { %v835_v40 = vld [vmem:[#allocation8 + $0x94] ss:$8 sps:$4 sm:$0xff]   ;;  %v837_v41 = vld [vmem:[#allocation8 + $0x90] ss:$8 sps:$4 sm:$0xff]   ;;  %v838_v42 = vld [vmem:[#allocation8 + $0x84] ss:$8 sps:$4 sm:$0xff]  }
  0x51   :  { %457 = vmatpush1.bf16.msra.mxu0 %v801_v16  ;;  %v840_v43 = vld [vmem:[#allocation8 + $0x80] ss:$8 sps:$4 sm:$0xff]   ;;  %v841_v44 = vld [vmem:[#allocation10 + $0x78] sm:$0xff]   ;;  %v843_v46 = vld [vmem:[#allocation10 + $0x70] sm:$0xff]   ;;  %v233_v57 = vshrl.u32 %v232_v56, 7 }
  0x52   :  { %458 = vmatprep.subr.bf16.mxu0 %v802_v18  ;;  %v842_v45 = vld [vmem:[#allocation10 + $0x38] sm:$0xff]   ;;  %755 = vmatprep.subr.bf16.mxu1 %v841_v44  ;;  %v844_v47 = vld [vmem:[#allocation10 + $0x30] sm:$0xff]   ;;  %v845_v48 = vld [vmem:[#allocation10 + $0x68] sm:$0xff]  }
  0x53   :  { %704 = vmatmul.mubr.msk.bf16.vlgmr.msra.gmra.mxu1 %vm178_vm3, %v104_v17  ;;  %v846_v49 = vld [vmem:[#allocation10 + $0x28] sm:$0xff]   ;;  %v847_v50 = vld [vmem:[#allocation10 + $0x60] sm:$0xff]   ;;  %v849_v52 = vld [vmem:[#allocation10 + $0x58] sm:$0xff]   ;;  %v234_v60 = vsub.s32 0, %v233_v57  ;;  %v238_v63 = vsub.s32 1, %v233_v57 }
  0x54   :  { %756 = vmatpush3.bf16.msra.mxu1 %v842_v45  ;;  %v848_v51 = vld [vmem:[#allocation10 + $0x20] sm:$0xff]   ;;  %v850_v53 = vld [vmem:[#allocation10 + $0x18] sm:$0xff]   ;;  %v851_v54 = vld [vmem:[#allocation10 + $0x50] sm:$0xff]  }
  0x55   :  { %459 = vmatpush1.bf16.msra.mxu0 %v804_v19  ;;  %757 = vmatprep.subr.bf16.mxu1 %v843_v46  ;;  %v852_v55 = vld [vmem:[#allocation10 + $0x10] sm:$0xff]   ;;  %v230_v62 = vld [vmem:[%s1098_s4] sm:$0x3]  ;;  %v853_v16 = vld [vmem:[#allocation10 + $0x48] sm:$0xff]  }
  0x56   :  { %460 = vmatprep.subr.bf16.mxu0 %v805_v20  ;;  %v235_v1 = vrot.slane %v230_v62, %v234_v60  ;;  %v239_v4 = vrot.slane %v230_v62, %v238_v63  ;;  %v854_v17 = vld [vmem:[#allocation10 + $0x8] sm:$0xff]   ;;  %v855_v18 = vld [vmem:[#allocation10 + $0x40] sm:$0xff]  }
  0x57   :  { %v856_v19 = vld [vmem:[#allocation10] sm:$0xff]  }
  0x58   :  { %758 = vmatpush3.bf16.msra.mxu1 %v844_v47  ;;  %v280_v20 = vld [vmem:[%s1100_s6] sm:$0x3] }
  0x59   :  { %461 = vmatpush1.bf16.msra.mxu0 %v807_v21  ;;  %759 = vmatprep.subr.bf16.mxu1 %v845_v48  ;;  %v285_v21 = vrot.slane %v280_v20, %v234_v60 }
  0x5a   :  { %462 = vmatprep.subr.bf16.mxu0 %v808_v22  ;;  %v289_v22 = vrot.slane %v280_v20, %v238_v63 }
  0x5c   :  { %760 = vmatpush3.bf16.msra.mxu1 %v846_v49 }
  0x5d   :  { %463 = vmatpush1.bf16.msra.mxu0 %v810_v23  ;;  %761 = vmatprep.subr.bf16.mxu1 %v847_v50 }
  0x5e   :  { %464 = vmatprep.subr.bf16.mxu0 %v811_v24 }
  0x60   :  { %762 = vmatpush3.bf16.msra.mxu1 %v848_v51 }
  0x61   :  { %465 = vmatpush1.bf16.msra.mxu0 %v813_v25  ;;  %763 = vmatprep.subr.bf16.mxu1 %v849_v52 }
  0x62   :  { %466 = vmatprep.subr.bf16.mxu0 %v814_v26 }
  0x64   :  { %764 = vmatpush3.bf16.msra.mxu1 %v850_v53 }
  0x65   :  { %467 = vmatpush1.bf16.msra.mxu0 %v816_v27  ;;  %765 = vmatprep.subr.bf16.mxu1 %v851_v54 }
  0x66   :  { %468 = vmatprep.subr.bf16.mxu0 %v817_v28 }
  0x68   :  { %766 = vmatpush3.bf16.msra.mxu1 %v852_v55 }
  0x69   :  { %469 = vmatpush2.bf16.msra.mxu0 %v819_v29  ;;  %767 = vmatprep.subr.bf16.mxu1 %v853_v16 }
  0x6a   :  { %470 = vmatprep.subr.bf16.mxu0 %v820_v30 }
  0x6c   :  { %768 = vmatpush3.bf16.msra.mxu1 %v854_v17 }
  0x6d   :  { %471 = vmatpush2.bf16.msra.mxu0 %v822_v31  ;;  %769 = vmatprep.subr.bf16.mxu1 %v855_v18 }
  0x6e   :  { %472 = vmatprep.subr.bf16.mxu0 %v823_v32 }
  0x70   :  { %770 = vmatpush3.bf16.msra.mxu1 %v856_v19 }
  0x71   :  { %473 = vmatpush2.bf16.msra.mxu0 %v825_v33 }
  0x72   :  { %474 = vmatprep.subr.bf16.mxu0 %v826_v34  ;;  %v737_v34 = vld [vmem:[%s1102_s8] ss:$0 sm:$0xff] }
  0x75   :  { %475 = vmatpush2.bf16.msra.mxu0 %v828_v35 }
  0x76   :  { %476 = vmatprep.subr.bf16.mxu0 %v829_v36 }
  0x79   :  { %477 = vmatpush2.bf16.msra.mxu0 %v831_v37 }
  0x7a   :  { %478 = vmatprep.subr.bf16.mxu0 %v832_v38 }
  0x7d   :  { %479 = vmatpush2.bf16.msra.mxu0 %v834_v39 }
  0x7e   :  { %480 = vmatprep.subr.bf16.mxu0 %v835_v40 }
  0x81   :  { %481 = vmatpush2.bf16.msra.mxu0 %v837_v41 }
  0x82   :  { %482 = vmatprep.subr.bf16.mxu0 %v838_v42 }
  0x85   :  { %483 = vmatpush2.bf16.msra.mxu0 %v840_v43 }
 0x10b   :  { %v163_v58 = vpop.f32.mrf.mxu1 }
 0x10d   :  { %v165_v59 = vpop.f32.mrf.mxu1 }
 0x10f   :  { %v167_v61 = vpop.f32.mrf.mxu1 }
 0x111   :  { %v168_v0 = vpop.f32.mrf.mxu1 }
 0x113   :  { %v223_v2 = vpop.f32.mrf.mxu1 }
 0x114   :  { %v224_v3 = vadd.f32 %v223_v2, %v163_v58 }
 0x115   :  { %v225_v6 = vpop.f32.mrf.mxu1 }
 0x116   :  { %v242_v7 = vadd.f32 %v235_v1, %v224_v3  ;;  %v226_v8 = vadd.f32 %v225_v6, %v165_v59 }
 0x117   :  { %v227_v9 = vpop.f32.mrf.mxu1 }
 0x118   :  { %v243_v10 = vadd.f32 %v239_v4, %v226_v8  ;;  %v244_v11 = vmax.f32 %v242_v7, 0.0 }
 0x119   :  { %v228_v12 = vpop.f32.mrf.mxu1 }
 0x11a   :  { %v245_v13 = vmax.f32 %v243_v10, 0.0  ;;  %v246_v15 = vpack.c.bf16 %v244_v11, %v244_v11 }
 0x11c   :  { %v247_v14 = vpack.c.bf16 %v245_v13, %v245_v13 }
 0x11e   :  { %484 = vmatprep.mubr.bf16.mxu0 %v247_v14 }
 0x11f   :  { %485 = vmatmul.mubr.bf16.vlgmr.msra.gmra.mxu0 %v246_v15 }
 0x1df   :  { %v486_v23 = vpop.f32.mrf.mxu0 }
 0x1e0   :  { %v487_v24 = vadd.f32 %v486_v23, %v285_v21 }
 0x1e1   :  { %v488_v25 = vpop.f32.mrf.mxu0 }
 0x1e2   :  { %v489_v26 = vadd.f32 %v488_v25, %v289_v22  ;;  %v493_v27 = vmax.f32 %v487_v24, 0.0 }
 0x1e3   :  { %v490_v28 = vpop.f32.mrf.mxu0 }
 0x1e4   :  { %v494_v29 = vmax.f32 %v489_v26, 0.0  ;;  %v495_v32 = vpack.c.bf16 %v493_v27, %v493_v27 }
 0x1e5   :  { %v491_v30 = vpop.f32.mrf.mxu0 }
 0x1e6   :  { %v496_v31 = vpack.c.bf16 %v494_v29, %v494_v29 }
 0x1e8   :  { %664 = vmatprep.mubr.bf16.mxu1 %v496_v31 }
 0x1e9   :  { %665 = vmatmul.mubr.bf16.vlgmr.msra.gmra.mxu1 %v495_v32 }
 0x2a9   :  { %v771_v33 = vpop.f32.mrf.mxu1 }
 0x2ab   :  { %v772_v35 = vpop.f32.mrf.mxu1 }
 0x2ac   :  { %v773_v36 = vadd.f32 %v772_v35, %v771_v33 }
 0x2ad   :  { %v774_v37 = vpop.f32.mrf.mxu1 }
 0x2ae   :  { %v667_v38 = vadd.f32 %v773_v36, %v737_v34 }
 0x2af   :  { %v775_v39 = vpop.f32.mrf.mxu1 }
 0x2b0   :  { %857 = vtanh.f32 %v667_v38 }
 0x2bd   :  { %v858_v40 = vpop.eup %857 }
 0x2be   :  { %v674_v41 = vmul.f32 0.05, %v858_v40 }
 0x2c0   :  { %v675_v42 = vadd.f32 %v674_v41, %v1075_v5 }
 0x2c2   :  { %v754_v43 = vclamps-f32 %v675_v42, 1.0 }
 0x2c4   :  { %678 = vst [vmem:[#allocation11] sm:$0xff] %v754_v43 }
 0x2c5   :  { %683 = vsyncadd [#allocation4], 96  ;;  %s999_s6 = smov [#allocation11]  }
 0x2c6   :  { %s684_s23 = sshll.u32 %s999_s6, 4  ;;  %s685_s23 = int_to_ptr.vmem [resolvable:$true] %s684_s23 }
 0x2c7   :  { %s959_s24 = scalar_lea.vmem %s685_s23, 32  ;;  %s963_s25 = scalar_lea.vmem %s685_s23, 128 }
 0x2c8   :  { %p960_p11 = scmp.ne.s32.totalorder %s685_s23, %s959_s24  ;;  %p964_p12 = scmp.lt.s32.totalorder %s685_s23, %s685_s23 }
 0x2c9   :  { %p965_p13 = scmp.lt.s32.totalorder %s963_s25, %s959_s24 }
 0x2cb   :  { %p966_p0 = por %p965_p13, %p964_p12 }
 0x2cd   :  { %p967_p1 = pnand %p966_p0, %p960_p11 }
 0x2cf   :  { %970 = shalt.err (!%p967_p1)
}
 0x2d0   :  { %690 = dma.vmem_to_hbm [thread:$0]  %s685_s23, 32, %s1103_s9, [#allocation4], %s988_s13, %s988_s13, %s989_s14  }
 0x2d1   :  { %985 = dma.done.wait [#allocation4], 128  }
 0x2d2   :  { %986 = vsyncadd [#allocation4], 4294967168 }
 0x2d3   :  { %694 = vsyncpa [#allocation3], 1 }
 0x2d4   :  { %695 = vsyncpa [#allocation6], 1 }
 0x2d5   :  { %696 = vsyncpa [#allocation9], 1 }
 0x2d6   :  { %697 = vsyncpa [#allocation4], 1 }

</bundles_post_ra>
